<compile_context>
chip_gen: v5e
topology: v5e:2x2
jax: 0.10.0
libtpu: 0.0.40
codegen_flags: <defaults>
</compile_context>

<pallas_src>
import functools

import jax
import jax.numpy as jnp
from jax.experimental import pallas as pl
from jax.experimental.pallas import tpu as pltpu

NUM_BOND_TYPE = 6
NUM_BOND_DIRECTION = 3
NUM_ATOM_TYPE = 35
NUM_CHIRALITY_TAG = 3


def _ceil_to(x, m):
    return ((x + m - 1) // m) * m


# ----------------------------------------------------------------------------
# Deterministic parameter init (synthetic weights, xavier-ish uniform)
# ----------------------------------------------------------------------------
def _xavier_uniform(key, shape):
    fan_out, fan_in = shape[0], shape[1]
    bound = (6.0 / (fan_in + fan_out)) ** 0.5
    return jax.random.uniform(key, shape, jnp.float32, -bound, bound)


def _linear_uniform(key, shape):
    fan_in = shape[-1]
    bound = 1.0 / (fan_in ** 0.5)
    return jax.random.uniform(key, shape, jnp.float32, -bound, bound)


# ----------------------------------------------------------------------------
# Fused Pallas kernel: grid=(num_layer,), one grid step = one GraphSAGE layer
#   message   : x_j + edge_emb              (bf16 one-hot gather matmul, MXU)
#   aggregate : mean over incoming edges    (bf16 one-hot scatter matmul + inv_deg, VPU)
#   update    : L2-normalize rows           (rsqrt, EUP)
#   then BatchNorm1d (training batch stats) + ReLU (all but last layer)
# Last grid step additionally does global mean pool + graph_pred_linear.
# ----------------------------------------------------------------------------
def _fused_gnn_kernel(h0_ref, gather_ref, scatter_t_ref, inv_deg_ref,
                      edge_emb_ref, gamma_ref, beta_ref,
                      pool_ref, w_ref, b_ref,
                      out_ref, h_scratch, *, inv_n):
    l = pl.program_id(0)
    last = pl.num_programs(0) - 1

    @pl.when(l == 0)
    def _():
        h_scratch[...] = h0_ref[...]

    inv_deg = inv_deg_ref[...]                          # (N_pad, 1) f32
    # every real node has a self-loop -> deg >= 1; padded nodes have inv_deg == 0
    node_mask = (inv_deg > 0.0).astype(jnp.float32)

    # message: x_j + edge_emb  (gather via bf16 one-hot matmul on the MXU, f32 acc)
    xj = jnp.dot(gather_ref[...], h_scratch[...].astype(jnp.bfloat16),
                 preferred_element_type=jnp.float32)    # (E_pad, D_pad)
    msg = xj + edge_emb_ref[...]

    # mean aggregate: unnormalized one-hot scatter (MXU) + inv-degree scale (VPU)
    aggr = jnp.dot(scatter_t_ref[...], msg.astype(jnp.bfloat16),
                   preferred_element_type=jnp.float32)  # (N_pad, D_pad)
    aggr = aggr * inv_deg

    # update(): F.normalize(aggr, p=2, dim=-1)   (== aggr / max(||aggr||, 1e-12))
    sq = jnp.sum(aggr * aggr, axis=-1, keepdims=True)
    h = aggr * jax.lax.rsqrt(jnp.maximum(sq, 1e-24))

    # BatchNorm1d, training mode (biased batch stats over real nodes only), eps=1e-5
    hm = h * node_mask
    mean = jnp.sum(hm, axis=0, keepdims=True) * inv_n
    cent = (h - mean) * node_mask
    var = jnp.sum(cent * cent, axis=0, keepdims=True) * inv_n
    h_bn = (h - mean) * jax.lax.rsqrt(var + 1e-5) * gamma_ref[...] + beta_ref[...]

    # dropout with drop_ratio=0 is the identity
    @pl.when(l != last)
    def _():
        h_scratch[...] = jnp.maximum(h_bn, 0.0)         # ReLU on all but last layer

    @pl.when(l == last)
    def _():
        # JK == 'last' -> node_representation = h_bn
        pooled = jnp.dot(pool_ref[...], h_bn,
                         preferred_element_type=jnp.float32)      # (G_pad, D_pad)
        out_ref[...] = jnp.dot(pooled, w_ref[...],
                               preferred_element_type=jnp.float32) + b_ref[...]


# ----------------------------------------------------------------------------
# Forward pass of GNN_graphpred
# ----------------------------------------------------------------------------
def gnn_graphpred_forward(params, x, edge_index, edge_attr, batch, num_graphs):
    N = x.shape[0]
    E = edge_index.shape[1]
    D = params["x_emb1"].shape[1]
    L = len(params["layers"])
    E_tot = E + N                                   # edges + self loops

    N_pad = _ceil_to(N, 8)
    E_pad = _ceil_to(E_tot, 16)                     # bf16 sublane tile
    G_pad = _ceil_to(num_graphs, 8)
    D_pad = _ceil_to(D, 128)                        # lane-dense embedding dim

    # ---- node embedding: x_embedding1(x[:,0]) + x_embedding2(x[:,1])  (glue) ----
    h0 = (jnp.take(params["x_emb1"], x[:, 0], axis=0)
          + jnp.take(params["x_emb2"], x[:, 1], axis=0))            # (N, D)
    h0 = jnp.zeros((N_pad, D_pad), jnp.float32).at[:N, :D].set(h0)

    # ---- add self loops (i, i) with edge_attr = [4, 0] ----
    loop = jnp.arange(N, dtype=edge_index.dtype)
    src = jnp.concatenate([edge_index[0], loop])    # x_j source (source_to_target)
    dst = jnp.concatenate([edge_index[1], loop])    # aggregation target
    self_loop_attr = jnp.zeros((N, 2), edge_attr.dtype).at[:, 0].set(4)
    edge_attr_full = jnp.concatenate([edge_attr, self_loop_attr], axis=0)

    # ---- one-hot gather / scatter matrices (bf16: 0/1 exact) + inv_deg ----
    gather = jnp.zeros((E_pad, N_pad), jnp.bfloat16).at[:E_tot].set(
        jax.nn.one_hot(src, N_pad, dtype=jnp.bfloat16))             # [E_pad, N_pad]
    dst_oh = jax.nn.one_hot(dst, N_pad, dtype=jnp.float32)          # [E_tot, N_pad]
    scatter_t = jnp.zeros((N_pad, E_pad), jnp.bfloat16).at[:, :E_tot].set(
        dst_oh.T.astype(jnp.bfloat16))                              # [N_pad, E_pad]
    deg = jnp.sum(dst_oh, axis=0)                                   # [N_pad]
    inv_deg = jnp.where(deg > 0.0, 1.0 / jnp.maximum(deg, 1.0), 0.0
                        ).reshape(N_pad, 1).astype(jnp.float32)

    # ---- per-layer edge embeddings + BN params, stacked on a layer axis ----
    edge_embs, gammas, betas = [], [], []
    for lp in params["layers"]:
        ee = (jnp.take(lp["edge_emb1"], edge_attr_full[:, 0], axis=0)
              + jnp.take(lp["edge_emb2"], edge_attr_full[:, 1], axis=0))   # (E_tot, D)
        edge_embs.append(jnp.zeros((E_pad, D_pad), jnp.float32).at[:E_tot, :D].set(ee))
        gammas.append(jnp.zeros((1, D_pad), jnp.float32).at[:, :D].set(lp["bn_gamma"]))
        betas.append(jnp.zeros((1, D_pad), jnp.float32).at[:, :D].set(lp["bn_beta"]))
    edge_emb_stack = jnp.stack(edge_embs)           # (L, E_pad, D_pad)
    gamma_stack = jnp.stack(gammas)                 # (L, 1, D_pad)
    beta_stack = jnp.stack(betas)                   # (L, 1, D_pad)

    # ---- global mean pool matrix (row-normalized one-hot of batch) ----
    batch_oh = jax.nn.one_hot(batch, G_pad, dtype=jnp.float32)      # (N, G_pad)
    counts = jnp.sum(batch_oh, axis=0)
    pool_mat = jnp.zeros((G_pad, N_pad), jnp.float32).at[:, :N].set(
        (batch_oh / jnp.maximum(counts, 1.0)[None, :]).T)

    # ---- prediction head, lane-padded to 128 output columns ----
    w_pad = jnp.zeros((D_pad, 128), jnp.float32).at[:D, 0:1].set(params["pred_w"])
    b_pad = jnp.broadcast_to(params["pred_b"], (1, 128)).astype(jnp.float32)

    # ---- advisory cost estimate ----
    flops = L * 4 * E_pad * N_pad * D_pad + 2 * G_pad * N_pad * D_pad + 2 * G_pad * D_pad * 128
    bytes_accessed = (h0.size * 4 + gather.size * 2 + scatter_t.size * 2 + inv_deg.size * 4
                      + edge_emb_stack.size * 4 + gamma_stack.size * 4 + beta_stack.size * 4
                      + pool_mat.size * 4 + w_pad.size * 4 + b_pad.size * 4 + G_pad * 128 * 4)
    cost = pl.CostEstimate(flops=int(flops), transcendentals=int(L * (N_pad + D_pad)),
                           bytes_accessed=int(bytes_accessed))

    kernel = functools.partial(_fused_gnn_kernel, inv_n=1.0 / float(N))
    out = pl.pallas_call(
        kernel,
        out_shape=jax.ShapeDtypeStruct((G_pad, 128), jnp.float32),
        grid=(L,),
        in_specs=[
            pl.BlockSpec((N_pad, D_pad), lambda l: (0, 0)),        # h0
            pl.BlockSpec((E_pad, N_pad), lambda l: (0, 0)),        # gather one-hot (bf16)
            pl.BlockSpec((N_pad, E_pad), lambda l: (0, 0)),        # dst one-hot^T (bf16)
            pl.BlockSpec((N_pad, 1), lambda l: (0, 0)),            # inv_deg
            pl.BlockSpec((None, E_pad, D_pad), lambda l: (l, 0, 0)),  # per-layer edge_emb
            pl.BlockSpec((None, 1, D_pad), lambda l: (l, 0, 0)),   # per-layer bn gamma
            pl.BlockSpec((None, 1, D_pad), lambda l: (l, 0, 0)),   # per-layer bn beta
            pl.BlockSpec((G_pad, N_pad), lambda l: (0, 0)),        # mean-pool matrix
            pl.BlockSpec((D_pad, 128), lambda l: (0, 0)),          # pred weight (lane-padded)
            pl.BlockSpec((1, 128), lambda l: (0, 0)),              # pred bias
        ],
        out_specs=pl.BlockSpec((G_pad, 128), lambda l: (0, 0)),
        scratch_shapes=[pltpu.VMEM((N_pad, D_pad), jnp.float32)],  # h carried across layers
        compiler_params=pltpu.CompilerParams(
            dimension_semantics=("arbitrary",),                    # layers are sequential
            vmem_limit_bytes=48 * 1024 * 1024,                     # fits v7x 64 MiB budget
        ),
        cost_estimate=cost,
    )(h0, gather, scatter_t, inv_deg, edge_emb_stack, gamma_stack, beta_stack,
      pool_mat, w_pad, b_pad)

    return out[:num_graphs, :1]


# ----------------------------------------------------------------------------
if __name__ == "__main__":
    num_layer = 2
    emb_dim = 32
    N, E, num_graphs = 16, 24, 2

    key = jax.random.PRNGKey(0)
    ks = jax.random.split(key, 8 + 2 * num_layer)

    layers = []
    for l in range(num_layer):
        layers.append({
            "edge_emb1": _xavier_uniform(ks[4 + 2 * l], (NUM_BOND_TYPE, emb_dim)),
            "edge_emb2": _xavier_uniform(ks[5 + 2 * l], (NUM_BOND_DIRECTION, emb_dim)),
            "bn_gamma": jnp.ones((1, emb_dim), jnp.float32),
            "bn_beta": jnp.zeros((1, emb_dim), jnp.float32),
        })

    params = {
        "x_emb1": _xavier_uniform(ks[0], (NUM_ATOM_TYPE, emb_dim)),
        "x_emb2": _xavier_uniform(ks[1], (NUM_CHIRALITY_TAG, emb_dim)),
        "layers": layers,
        "pred_w": _linear_uniform(ks[2], (emb_dim, 1)),   # Linear(emb_dim, 1) weight^T
        "pred_b": _linear_uniform(ks[3], (1, 1)),         # bias
    }

    dk = jax.random.split(jax.random.PRNGKey(0), 5)
    x = jnp.stack([
        jax.random.randint(dk[0], (N,), 0, NUM_ATOM_TYPE),
        jax.random.randint(dk[1], (N,), 0, NUM_CHIRALITY_TAG),
    ], axis=1).astype(jnp.int32)                                   # [N, 2]
    edge_index = jax.random.randint(dk[2], (2, E), 0, N).astype(jnp.int32)
    edge_attr = jnp.stack([
        jax.random.randint(dk[3], (E,), 0, NUM_BOND_TYPE),
        jax.random.randint(dk[4], (E,), 0, NUM_BOND_DIRECTION),
    ], axis=1).astype(jnp.int32)                                   # [E, 2]
    batch = jnp.concatenate([
        jnp.zeros((N // 2,), jnp.int32), jnp.ones((N - N // 2,), jnp.int32)
    ])                                                             # [N]

    out = gnn_graphpred_forward(params, x, edge_index, edge_attr, batch, num_graphs)
    out = jax.block_until_ready(out)
    assert out.shape == (num_graphs, 1), out.shape
    assert bool(jnp.all(jnp.isfinite(out)))
    print("KERNEL_OK")
</pallas_src>

<mosaic_0001>
module attributes {stable_mosaic.version = 11 : i64} {
  func.func @_fused_gnn_kernel(%arg0: i32, %arg1: memref<16x128xf32, #tpu.memory_space<vmem>>, %arg2: memref<48x16xbf16, #tpu.memory_space<vmem>>, %arg3: memref<16x48xbf16, #tpu.memory_space<vmem>>, %arg4: memref<16x1xf32, #tpu.memory_space<vmem>>, %arg5: memref<1x48x128xf32, #tpu.memory_space<vmem>>, %arg6: memref<1x1x128xf32, #tpu.memory_space<vmem>>, %arg7: memref<1x1x128xf32, #tpu.memory_space<vmem>>, %arg8: memref<8x16xf32, #tpu.memory_space<vmem>>, %arg9: memref<128x128xf32, #tpu.memory_space<vmem>>, %arg10: memref<1x128xf32, #tpu.memory_space<vmem>>, %arg11: memref<8x128xf32, #tpu.memory_space<vmem>>, %arg12: memref<16x128xf32, #tpu.memory_space<vmem>>) attributes {dimension_semantics = [#tpu.dimension_semantics<arbitrary>], iteration_bounds = array<i64: 2>, scalar_prefetch = 0 : i64, scratch_operands = 1 : i64, tpu.core_type = #tpu.core_type<tc>, window_params = [{pipeline_mode = #tpu.pipeline_mode<synchronous>, transform_indices = @transform_0, window_bounds = array<i64: 16, 128>}, {pipeline_mode = #tpu.pipeline_mode<synchronous>, transform_indices = @transform_1, window_bounds = array<i64: 48, 16>}, {pipeline_mode = #tpu.pipeline_mode<synchronous>, transform_indices = @transform_2, window_bounds = array<i64: 16, 48>}, {pipeline_mode = #tpu.pipeline_mode<synchronous>, transform_indices = @transform_3, window_bounds = array<i64: 16, 1>}, {transform_indices = @transform_4, window_bounds = array<i64: 1, 48, 128>}, {transform_indices = @transform_5, window_bounds = array<i64: 1, 1, 128>}, {transform_indices = @transform_6, window_bounds = array<i64: 1, 1, 128>}, {pipeline_mode = #tpu.pipeline_mode<synchronous>, transform_indices = @transform_7, window_bounds = array<i64: 8, 16>}, {pipeline_mode = #tpu.pipeline_mode<synchronous>, transform_indices = @transform_8, window_bounds = array<i64: 128, 128>}, {pipeline_mode = #tpu.pipeline_mode<synchronous>, transform_indices = @transform_9, window_bounds = array<i64: 1, 128>}, {pipeline_mode = #tpu.pipeline_mode<synchronous>, transform_indices = @transform_10, window_bounds = array<i64: 8, 128>}]} {
    %c0_i32 = arith.constant 0 : i32
    %0 = arith.cmpi eq, %arg0, %c0_i32 : i32
    %1 = arith.extui %0 : i1 to i32
    %c0_i32_0 = arith.constant 0 : i32
    %2 = arith.cmpi ne, %1, %c0_i32_0 : i32
    scf.if %2 {
      %c0_29 = arith.constant 0 : index
      %c0_30 = arith.constant 0 : index
      %64 = vector.load %arg1[%c0_29, %c0_30] : memref<16x128xf32, #tpu.memory_space<vmem>>, vector<16x128xf32>
      %c0_31 = arith.constant 0 : index
      %c0_32 = arith.constant 0 : index
      %65 = vector.load %arg12[%c0_31, %c0_32] : memref<16x128xf32, #tpu.memory_space<vmem>>, vector<16x128xf32>
      tpu.vector_store %arg12[%c0_31, %c0_32], %64 {strides = array<i32>} : memref<16x128xf32, #tpu.memory_space<vmem>>, vector<16x128xf32>,
    } else {
    }
    %c0 = arith.constant 0 : index
    %c0_1 = arith.constant 0 : index
    %3 = vector.load %arg4[%c0, %c0_1] : memref<16x1xf32, #tpu.memory_space<vmem>>, vector<16x1xf32>
    %cst = arith.constant 0.000000e+00 : f32
    %4 = vector.broadcast %cst : f32 to vector<16x1xf32>
    %5 = arith.cmpf ogt, %3, %4 : vector<16x1xf32>
    %6 = arith.extui %5 : vector<16x1xi1> to vector<16x1xi32>
    %7 = arith.sitofp %6 : vector<16x1xi32> to vector<16x1xf32>
    %c0_2 = arith.constant 0 : index
    %c0_3 = arith.constant 0 : index
    %8 = vector.load %arg2[%c0_2, %c0_3] : memref<48x16xbf16, #tpu.memory_space<vmem>>, vector<48x16xbf16>
    %c0_4 = arith.constant 0 : index
    %c0_5 = arith.constant 0 : index
    %9 = vector.load %arg12[%c0_4, %c0_5] : memref<16x128xf32, #tpu.memory_space<vmem>>, vector<16x128xf32>
    %10 = arith.truncf %9 : vector<16x128xf32> to vector<16x128xbf16>
    %cst_6 = arith.constant dense<0.000000e+00> : vector<48x128xf32>
    %11 = tpu.matmul %8, %10, %cst_6 {dimension_numbers = #tpu.dot_dimension_numbers<[1], [0], [0], [1], [0, 0, 1, 1], [], []>} : vector<48x16xbf16>, vector<16x128xbf16>, vector<48x128xf32> -> vector<48x128xf32>
    %c0_7 = arith.constant 0 : index
    %c0_8 = arith.constant 0 : index
    %c0_9 = arith.constant 0 : index
    %12 = vector.load %arg5[%c0_7, %c0_8, %c0_9] : memref<1x48x128xf32, #tpu.memory_space<vmem>>, vector<1x48x128xf32>
    %13 = vector.shape_cast %12 : vector<1x48x128xf32> to vector<48x128xf32>
    %14 = arith.addf %11, %13 : vector<48x128xf32>
    %c0_10 = arith.constant 0 : index
    %c0_11 = arith.constant 0 : index
    %15 = vector.load %arg3[%c0_10, %c0_11] : memref<16x48xbf16, #tpu.memory_space<vmem>>, vector<16x48xbf16>
    %16 = arith.truncf %14 : vector<48x128xf32> to vector<48x128xbf16>
    %cst_12 = arith.constant dense<0.000000e+00> : vector<16x128xf32>
    %17 = tpu.matmul %15, %16, %cst_12 {dimension_numbers = #tpu.dot_dimension_numbers<[1], [0], [0], [1], [0, 0, 1, 1], [], []>} : vector<16x48xbf16>, vector<48x128xbf16>, vector<16x128xf32> -> vector<16x128xf32>
    %18 = vector.broadcast %3 : vector<16x1xf32> to vector<16x128xf32>
    %19 = arith.mulf %17, %18 : vector<16x128xf32>
    %20 = arith.mulf %19, %19 : vector<16x128xf32>
    %cst_13 = arith.constant dense<0.000000e+00> : vector<16xf32>
    %21 = vector.multi_reduction <add>, %20, %cst_13 [1] : vector<16x128xf32> to vector<16xf32>
    %22 = vector.shape_cast %21 : vector<16xf32> to vector<16x1xf32>
    %cst_14 = arith.constant 1.000000e-24 : f32
    %23 = vector.broadcast %cst_14 : f32 to vector<16x1xf32>
    %24 = arith.maximumf %22, %23 : vector<16x1xf32>
    %25 = math.rsqrt %24 : vector<16x1xf32>
    %26 = vector.broadcast %25 : vector<16x1xf32> to vector<16x128xf32>
    %27 = arith.mulf %19, %26 : vector<16x128xf32>
    %28 = vector.broadcast %7 : vector<16x1xf32> to vector<16x128xf32>
    %29 = arith.mulf %27, %28 : vector<16x128xf32>
    %cst_15 = arith.constant dense<0.000000e+00> : vector<128xf32>
    %30 = vector.multi_reduction <add>, %29, %cst_15 [0] : vector<16x128xf32> to vector<128xf32>
    %31 = vector.shape_cast %30 : vector<128xf32> to vector<1x128xf32>
    %cst_16 = arith.constant 6.250000e-02 : f32
    %32 = vector.broadcast %cst_16 : f32 to vector<1x128xf32>
    %33 = arith.mulf %31, %32 : vector<1x128xf32>
    %34 = vector.broadcast %33 : vector<1x128xf32> to vector<16x128xf32>
    %35 = arith.subf %27, %34 : vector<16x128xf32>
    %36 = vector.broadcast %7 : vector<16x1xf32> to vector<16x128xf32>
    %37 = arith.mulf %35, %36 : vector<16x128xf32>
    %38 = arith.mulf %37, %37 : vector<16x128xf32>
    %cst_17 = arith.constant dense<0.000000e+00> : vector<128xf32>
    %39 = vector.multi_reduction <add>, %38, %cst_17 [0] : vector<16x128xf32> to vector<128xf32>
    %40 = vector.shape_cast %39 : vector<128xf32> to vector<1x128xf32>
    %cst_18 = arith.constant 6.250000e-02 : f32
    %41 = vector.broadcast %cst_18 : f32 to vector<1x128xf32>
    %42 = arith.mulf %40, %41 : vector<1x128xf32>
    %43 = vector.broadcast %33 : vector<1x128xf32> to vector<16x128xf32>
    %44 = arith.subf %27, %43 : vector<16x128xf32>
    %cst_19 = arith.constant 9.99999974E-6 : f32
    %45 = vector.broadcast %cst_19 : f32 to vector<1x128xf32>
    %46 = arith.addf %42, %45 : vector<1x128xf32>
    %47 = math.rsqrt %46 : vector<1x128xf32>
    %48 = vector.broadcast %47 : vector<1x128xf32> to vector<16x128xf32>
    %49 = arith.mulf %44, %48 : vector<16x128xf32>
    %c0_20 = arith.constant 0 : index
    %c0_21 = arith.constant 0 : index
    %c0_22 = arith.constant 0 : index
    %50 = vector.load %arg6[%c0_20, %c0_21, %c0_22] : memref<1x1x128xf32, #tpu.memory_space<vmem>>, vector<1x1x128xf32>
    %51 = vector.shape_cast %50 : vector<1x1x128xf32> to vector<1x128xf32>
    %52 = vector.broadcast %51 : vector<1x128xf32> to vector<16x128xf32>
    %53 = arith.mulf %49, %52 : vector<16x128xf32>
    %c0_23 = arith.constant 0 : index
    %c0_24 = arith.constant 0 : index
    %c0_25 = arith.constant 0 : index
    %54 = vector.load %arg7[%c0_23, %c0_24, %c0_25] : memref<1x1x128xf32, #tpu.memory_space<vmem>>, vector<1x1x128xf32>
    %55 = vector.shape_cast %54 : vector<1x1x128xf32> to vector<1x128xf32>
    %56 = vector.broadcast %55 : vector<1x128xf32> to vector<16x128xf32>
    %57 = arith.addf %53, %56 : vector<16x128xf32>
    %c1_i32 = arith.constant 1 : i32
    %58 = arith.cmpi ne, %arg0, %c1_i32 : i32
    %59 = arith.extui %58 : i1 to i32
    %c0_i32_26 = arith.constant 0 : i32
    %60 = arith.cmpi ne, %59, %c0_i32_26 : i32
    scf.if %60 {
      %cst_29 = arith.constant 0.000000e+00 : f32
      %64 = vector.broadcast %cst_29 : f32 to vector<16x128xf32>
      %65 = arith.maximumf %57, %64 : vector<16x128xf32>
      %c0_30 = arith.constant 0 : index
      %c0_31 = arith.constant 0 : index
      %66 = vector.load %arg12[%c0_30, %c0_31] : memref<16x128xf32, #tpu.memory_space<vmem>>, vector<16x128xf32>
      tpu.vector_store %arg12[%c0_30, %c0_31], %65 {strides = array<i32>} : memref<16x128xf32, #tpu.memory_space<vmem>>, vector<16x128xf32>,
    } else {
    }
    %c1_i32_27 = arith.constant 1 : i32
    %61 = arith.cmpi eq, %arg0, %c1_i32_27 : i32
    %62 = arith.extui %61 : i1 to i32
    %c0_i32_28 = arith.constant 0 : i32
    %63 = arith.cmpi ne, %62, %c0_i32_28 : i32
    scf.if %63 {
      %c0_29 = arith.constant 0 : index
      %c0_30 = arith.constant 0 : index
      %64 = vector.load %arg8[%c0_29, %c0_30] : memref<8x16xf32, #tpu.memory_space<vmem>>, vector<8x16xf32>
      %cst_31 = arith.constant dense<0.000000e+00> : vector<8x128xf32>
      %65 = tpu.matmul %64, %57, %cst_31 {dimension_numbers = #tpu.dot_dimension_numbers<[1], [0], [0], [1], [0, 0, 1, 1], [], []>} : vector<8x16xf32>, vector<16x128xf32>, vector<8x128xf32> -> vector<8x128xf32>
      %c0_32 = arith.constant 0 : index
      %c0_33 = arith.constant 0 : index
      %66 = vector.load %arg9[%c0_32, %c0_33] : memref<128x128xf32, #tpu.memory_space<vmem>>, vector<128x128xf32>
      %cst_34 = arith.constant dense<0.000000e+00> : vector<8x128xf32>
      %67 = tpu.matmul %65, %66, %cst_34 {dimension_numbers = #tpu.dot_dimension_numbers<[1], [0], [0], [1], [0, 0, 1, 1], [], []>} : vector<8x128xf32>, vector<128x128xf32>, vector<8x128xf32> -> vector<8x128xf32>
      %c0_35 = arith.constant 0 : index
      %c0_36 = arith.constant 0 : index
      %68 = vector.load %arg10[%c0_35, %c0_36] : memref<1x128xf32, #tpu.memory_space<vmem>>, vector<1x128xf32>
      %69 = vector.broadcast %68 : vector<1x128xf32> to vector<8x128xf32>
      %70 = arith.addf %67, %69 : vector<8x128xf32>
      %c0_37 = arith.constant 0 : index
      %c0_38 = arith.constant 0 : index
      %71 = vector.load %arg11[%c0_37, %c0_38] : memref<8x128xf32, #tpu.memory_space<vmem>>, vector<8x128xf32>
      tpu.vector_store %arg11[%c0_37, %c0_38], %70 {strides = array<i32>} : memref<8x128xf32, #tpu.memory_space<vmem>>, vector<8x128xf32>,
    } else {
    }
    return
  }
  func.func @transform_0(%arg0: i32) -> (i32, i32) {
    %c0_i32 = arith.constant 0 : i32
    %c0_i32_0 = arith.constant 0 : i32
    %c0_i32_1 = arith.constant 0 : i32
    return %c0_i32, %c0_i32_0 : i32, i32
  }
  func.func @transform_1(%arg0: i32) -> (i32, i32) {
    %c0_i32 = arith.constant 0 : i32
    %c0_i32_0 = arith.constant 0 : i32
    %c0_i32_1 = arith.constant 0 : i32
    return %c0_i32, %c0_i32_0 : i32, i32
  }
  func.func @transform_2(%arg0: i32) -> (i32, i32) {
    %c0_i32 = arith.constant 0 : i32
    %c0_i32_0 = arith.constant 0 : i32
    %c0_i32_1 = arith.constant 0 : i32
    return %c0_i32, %c0_i32_0 : i32, i32
  }
  func.func @transform_3(%arg0: i32) -> (i32, i32) {
    %c0_i32 = arith.constant 0 : i32
    %c0_i32_0 = arith.constant 0 : i32
    %c0_i32_1 = arith.constant 0 : i32
    return %c0_i32, %c0_i32_0 : i32, i32
  }
  func.func @transform_4(%arg0: i32) -> (i32, i32, i32) {
    %c0_i32 = arith.constant 0 : i32
    %c0_i32_0 = arith.constant 0 : i32
    %c0_i32_1 = arith.constant 0 : i32
    return %arg0, %c0_i32, %c0_i32_0 : i32, i32, i32
  }
  func.func @transform_5(%arg0: i32) -> (i32, i32, i32) {
    %c0_i32 = arith.constant 0 : i32
    %c0_i32_0 = arith.constant 0 : i32
    %c0_i32_1 = arith.constant 0 : i32
    return %arg0, %c0_i32, %c0_i32_0 : i32, i32, i32
  }
  func.func @transform_6(%arg0: i32) -> (i32, i32, i32) {
    %c0_i32 = arith.constant 0 : i32
    %c0_i32_0 = arith.constant 0 : i32
    %c0_i32_1 = arith.constant 0 : i32
    return %arg0, %c0_i32, %c0_i32_0 : i32, i32, i32
  }
  func.func @transform_7(%arg0: i32) -> (i32, i32) {
    %c0_i32 = arith.constant 0 : i32
    %c0_i32_0 = arith.constant 0 : i32
    %c0_i32_1 = arith.constant 0 : i32
    return %c0_i32, %c0_i32_0 : i32, i32
  }
  func.func @transform_8(%arg0: i32) -> (i32, i32) {
    %c0_i32 = arith.constant 0 : i32
    %c0_i32_0 = arith.constant 0 : i32
    %c0_i32_1 = arith.constant 0 : i32
    return %c0_i32, %c0_i32_0 : i32, i32
  }
  func.func @transform_9(%arg0: i32) -> (i32, i32) {
    %c0_i32 = arith.constant 0 : i32
    %c0_i32_0 = arith.constant 0 : i32
    %c0_i32_1 = arith.constant 0 : i32
    return %c0_i32, %c0_i32_0 : i32, i32
  }
  func.func @transform_10(%arg0: i32) -> (i32, i32) {
    %c0_i32 = arith.constant 0 : i32
    %c0_i32_0 = arith.constant 0 : i32
    %c0_i32_1 = arith.constant 0 : i32
    return %c0_i32, %c0_i32_0 : i32, i32
  }
}

</mosaic_0001>

<bundles_post_ra>
// kernel: tpu_custom_call.1
= control target key start
LH: loop header
LB: loop body
LE: loop exit
PB: predicated region body
PF: predicated region fallthrough
CT: control target
= control target key end

     0   :  { %s1287_s0 = inlined_call_operand.vmem [shape: f32[16,128], index: 0, kind: input, shape index: {}]   ;;  %s1288_s1 = inlined_call_operand.vmem [shape: bf16[48,16], index: 1, kind: input, shape index: {}]   ;;  %s1289_s2 = inlined_call_operand.vmem [shape: bf16[16,48], index: 2, kind: input, shape index: {}]   ;;  %s1290_s3 = inlined_call_operand.vmem [shape: f32[16,1], index: 3, kind: input, shape index: {}]   ;;  %s1291_s4 = inlined_call_operand.hbm [shape: f32[2,48,128], index: 4, kind: input, shape index: {}]   ;;  %s1292_s5 = inlined_call_operand.vmem [shape: f32[2,1,128], index: 5, kind: input, shape index: {}]   ;;  %s1293_s6 = inlined_call_operand.vmem [shape: f32[2,1,128], index: 6, kind: input, shape index: {}]   ;;  %s1294_s7 = inlined_call_operand.vmem [shape: f32[8,16], index: 7, kind: input, shape index: {}]   ;;  %s1295_s8 = inlined_call_operand.hbm [shape: f32[128,128], index: 8, kind: input, shape index: {}]   ;;  %s1296_s9 = inlined_call_operand.vmem [shape: f32[1,128], index: 9, kind: input, shape index: {}]   ;;  %s1297_s10 = inlined_call_operand.hbm [shape: f32[8,128], index: 10, kind: output, shape index: {}]  }
   0x1   :  { %1300 = sst [smem:[#allocation13_spill]] %s1295_s8 }
   0x2   :  { %15 = vsyncpa [#allocation4], 0 }
   0x3   :  { %17 = vsyncpa [#allocation4 + $0x1], 0 }
   0x4   :  { %18 = vsyncpa [#allocation7], 0 }
   0x5   :  { %19 = vsyncpa [#allocation5], 0  ;;  %s1103_s13 = smov 0   ;;  %s1105_s14 = smov 0  }
   0x6   :  { %s1107_s15 = smov 0   ;;  %s1109_s16 = smov 0  }
   0x7 LB: > { %s1122_s17 = sadd.s32 4294967295, %s1040_s16   ;;  %p129_p0 = scmp.ne.s32.totalorder %s1032_s14, %s1028_s13  ;;  %s1040_s16 = sphi %s1109_s16, %s1312_s16   ;;  %s1036_s15 = sphi %s1107_s15, %s1311_s15   ;;  %s1032_s14 = sphi %s1105_s14, %s1310_s14   ;;  %s1028_s13 = sphi %s1103_s13, %s1309_s13  }
   0x8   : > { %p130_p1 = scmp.eq.s32.totalorder %s1122_s17, 0  ;;  %p788_p2 = scmp.ge.s32.totalorder %s1040_s16, 1 }
   0x9   : > { %p276_p3 = scmp.lt.s32.totalorder %s1040_s16, 3  ;;  %p789_p4 = scmp.ne.s32.totalorder %s1122_s17, 0 }
   0xa   : > { %p1131_p5 = por %p130_p1, %p129_p0  ;;  %s1302_s8 = sld [smem:[#allocation13_spill]] }
   0xb   : > { %p1138_p6 = pnand %p788_p2, %p276_p3  ;;  %s1042_s23 = smov [#allocation6]  }
   0xc   : > { %s304_s24 = sshll.u32 %s1042_s23, 4  ;;  %s1147_s25 = sadd.s32 1, %s1040_s16   ;;  %s305_s24 = int_to_ptr.vmem [resolvable:$true] %s304_s24 }
   0xd   : > { %p843_p7 = pneg %p1138_p6  ;;  %s1298_s26 = smov 128  }
   0xe   : > { %s1299_s27 = smov 8   ;;  %s113_s28 = ssub.s32 %s1040_s16, %s1147_s25 }
   0xf   : > { %p844_p8 = pnand %p843_p7, %p130_p1  ;;  %s116_s29 = sadd.s32 1, %s1036_s15 }
  0x10   : > { %s302_s21 = sshll.u32 %s1302_s8, 4  ;;  %p114_p9 = scmp.eq.s32.totalorder %s113_s28, 0  ;;  %s303_s21 = int_to_ptr.hbm [resolvable:$true] %s302_s21 }
  0x11   : > { %846 = dma.hbm_to_vmem [thread:$0]  (!%p844_p8), %s303_s21, 2048, %s305_s24, [#allocation7], %s1298_s26, %s1298_s26, %s1299_s27  }
  0x12   : > { %p123_p10 = scmp.ne.s32.totalorder %s1036_s15, %s1032_s14  ;;  %p124_p11 = scmp.eq.s32.totalorder %s1040_s16, 0 }
  0x13   : > { %p852_p12 = scmp.lt.s32.totalorder %s1040_s16, 2  ;;  %s321_s11 = sand.u32 1, %s1036_s15  }
  0x14   : > { %s1160_s30 = scalar_select %p114_p9, %s1036_s15, %s116_s29  }
  0x15   : > { %p125_p13 = por %p124_p11, %p123_p10  ;;  %s830_s12 = smul.u32 48, %s321_s11 }
  0x16   : > { %1304 = sst [smem:[#allocation12_spill]] %s1160_s30  ;;  %s831_s13 = smul.u32 48, %s1040_s16 }
  0x17   : > { %p1164_p0 = pnand %p852_p12, %p125_p13  ;;  %s325_s24 = scalar_lea.vmem [#allocation3], %s830_s12 }
  0x18   : > { %s330_s21 = scalar_lea.hbm %s1291_s4, %s831_s13  ;;  %s333_s28 = sshll.u32 %s325_s24, 4  ;;  %s334_s28 = int_to_ptr.vmem [resolvable:$true] %s333_s28 }
  0x19   : > { %s331_s26 = sshll.u32 %s330_s21, 4  ;;  %s322_s29 = scalar_lea.sflag [#allocation4], %s321_s11  ;;  %s332_s26 = int_to_ptr.hbm [resolvable:$true] %s331_s26 }
  0x1a   : > { %s940_s27 = sshra.s32 %s332_s26, 4  ;;  %p944_p3 = pneg %p1164_p0  ;;  %s941_s27 = int_to_ptr.hbm [resolvable:$true] %s940_s27 }
  0x1b   : > { %s942_s8 = scalar_lea.hbm %s941_s27, 48  ;;  %s947_s20 = scalar_lea.hbm %s1291_s4, 96 }
  0x1c   : > { %p943_p2 = scmp.ne.s32.totalorder %s941_s27, %s942_s8  ;;  %p948_p9 = scmp.lt.s32.totalorder %s941_s27, %s1291_s4 }
  0x1d   : > { %p949_p10 = scmp.lt.s32.totalorder %s947_s20, %s942_s8 }
  0x1e   : > { %p945_p7 = pnand %p944_p3, %p943_p2 }
  0x1f   : > { %p950_p11 = por %p949_p10, %p948_p9 }
  0x20   : > { %p946_p8 = pneg %p945_p7 }
  0x22   : > { %p951_p12 = pnand %p950_p11, %p946_p8 }
  0x24   : > { %954 = shalt.err (!%p951_p12)
}
  0x25   : > { %s1306_s11 = smov 8   ;;  %s1307_s12 = smov 128  }
  0x26   : > { %850 = dma.hbm_to_vmem [thread:$0]  (!%p1164_p0), %s332_s26, 768, %s334_s28, %s322_s29, %s1307_s12, %s1307_s12, %s1306_s11  }
  0x27   : > { %357 = sbr.rel (%p1138_p6) target bundleno = 838 (0x346), region = 60  ;;  %s359_s30 = sand.u32 (!%p1138_p6), 1, %s1032_s14  }
  0x28   : > { %s832_s21 = smul.u32 (!%p1138_p6), 48, %s359_s30  ;;  %s360_s24 = scalar_lea.sflag (!%p1138_p6), [#allocation4], %s359_s30 }
  0x2a   : > { %s1187_s16 = scalar_lea.vmem (!%p1138_p6), [#allocation3], %s832_s21 }
  0x2c   : > { %1015 = dma.done.wait (%p1131_p5), %s360_s24, 768  }
  0x2d   : > { %1017 = vsyncadd (%p1131_p5), %s360_s24, 4294966528 }
  0x2e   : > { %1019 = dma.done.wait (%p130_p1), [#allocation7], 2048  }
  0x2f   : > { %1021 = vsyncadd (%p130_p1), [#allocation7], 4294965248  ;;  %p407_p6 = scmp.lt.s32.totalorder %s1122_s17, 1  ;;  %417 = sbr.rel (%p789_p4) target bundleno = 55 (0x37), region = 72 }
  0x31   : > { %s1199_s8 = scalar_select %p407_p6, %s1122_s17, 1 }
  0x33   : > { %s409_s27 = scalar_lea.vmem %s1292_s5, %s1199_s8  ;;  %s412_s28 = scalar_lea.vmem %s1293_s6, %s1199_s8 }
  0x34   : > { %v418_v0 = vld [vmem:[%s1287_s0] sm:$0xff]  ;;  %v419_v1 = vld [vmem:[%s1287_s0 + $0x8] sm:$0xff] }
  0x35   : > { %420 = vst [vmem:[#allocation2] sm:$0xff] %v418_v0 }
  0x36   : > { %421 = vst [vmem:[#allocation2 + $0x8] sm:$0xff] %v419_v1 }
  0x37 PF: > { %v825_v5 = vld [vmem:[%s1288_s1 + $0x8] sm:$0xff]  ;;  %v826_v6 = vld [vmem:[%s1288_s1 + $0x10] sm:$0xff]  ;;  %vm460_vm0 = vcmask 130048   ;;  %v824_v7 = vld [vmem:[%s1288_s1] sm:$0xff]  ;;  %v1045_v9 = vmov 0   ;;  %vm504_vm1 = vcmask 392192  }
  0x38   : > { %v422_v8 = vld [vmem:[%s1290_s3] sm:$0xff]  ;;  %894 = vset.pattern.permute.xlu0 %v1045_v9  ;;  %895 = vset.pattern.permute.xlu2 %v1045_v9  ;;  %v423_v10 = vld [vmem:[%s1290_s3 + $0x8] sm:$0xff]  ;;  %v1046_v33 = vmov 0.0   ;;  %p817_p1 = scmp.eq.s32.totalorder %s1122_s17, 1 }
  0x39   : > { %524 = vperm.xlu0 %894, %v422_v8   ;;  %v443_v14 = vld [vmem:[%s1187_s16 + $0x20] sm:$0xff]  ;;  %v444_v15 = vld [vmem:[%s1187_s16 + $0x28] sm:$0xff]  ;;  %v442_v16 = vld [vmem:[%s1187_s16 + $0x18] sm:$0xff]  ;;  %vm424_vm2 = vcmp.gt.f32.partialorder %v422_v8, 0.0  ;;  %vm425_vm3 = vcmp.gt.f32.partialorder %v423_v10, 0.0 }
  0x3a   : > { %v441_v21 = vld [vmem:[%s1187_s16 + $0x10] sm:$0xff]  ;;  %v439_v24 = vld [vmem:[%s1187_s16] sm:$0xff]  ;;  %v440_v25 = vld [vmem:[%s1187_s16 + $0x8] sm:$0xff]  ;;  %v795_v34 = vsel %vm424_vm2, 1.0, %v1046_v33  ;;  %v796_v35 = vsel %vm425_vm3, 1.0, %v1046_v33 }
  0x3b   : > { %v827_v32 = vld [vmem:[%s1289_s2] sm:$0xff]  ;;  %v896_v36 = vpack.i.bf16 %v796_v35, %v795_v34 }
  0x3c   : > { %v436_v2 = vld [vmem:[#allocation2] sm:$0xff] }
  0x3d   : > { %v437_v3 = vld [vmem:[#allocation2 + $0x8] sm:$0xff]  ;;  %897 = vperm.xlu2 %895, %v896_v36   ;;  %v901_v35 = vld [vmem:[%s409_s27] ss:$0 sm:$0xff] }
  0x3e   : > { %v438_v4 = vpack.c.bf16 %v437_v3, %v436_v2 }
  0x40   : > { %828 = vmatpush.bf16.msra.mxu2 %v438_v4  ;;  %829 = vmatpush.bf16.msra.mxu3 %v438_v4 }
  0x41   : > { %477 = vmatpush.bf16.msra.mxu0 %v438_v4  ;;  %529 = vperm.xlu0 %894, %v423_v10  }
  0x43   : > { %810 = vmatmul.msk.bf16.vlgmr.msra.gmra.mxu2 %vm460_vm0, %v825_v5  ;;  %811 = vmatmul.msk.bf16.vlgmr.msra.gmra.mxu3 %vm460_vm0, %v826_v6 }
  0x44   : > { %809 = vmatmul.msk.bf16.vlgmr.msra.gmra.mxu0 %vm460_vm0, %v824_v7 }
  0x97   : > { %v898_v61 = vpop.permute.xlu2 %897 }
  0x98   : > { %v900_v0 = vunpack.i.h.bf16 %v898_v61  ;;  %v899_v1 = vunpack.i.l.bf16 %v898_v61 }
  0xab   : > { %v525_v37 = vpop.permute.xlu0 %524 }
  0xb3   : > { %v530_v41 = vpop.permute.xlu0 %529 }
  0xc1   : > { %v479_v13 = vpop.f32.mrf.mxu0 }
  0xc2   : > { %v480_v28 = vadd.f32 %v479_v13, %v439_v24 }
  0xc6   : > { %v484_v11 = vpop.f32.mrf.mxu2  ;;  %v489_v12 = vpop.f32.mrf.mxu3 }
  0xc7   : > { %v490_v19 = vadd.f32 %v489_v12, %v443_v14  ;;  %v485_v27 = vadd.f32 %v484_v11, %v441_v21 }
  0xc9   : > { %v481_v26 = vpop.f32.mrf.mxu0 }
  0xca   : > { %v482_v29 = vadd.f32 %v481_v26, %v440_v25 }
  0xcc   : > { %v496_v31 = vpack.c.bf16 %v482_v29, %v480_v28 }
  0xce   : > { %v486_v17 = vpop.f32.mrf.mxu2  ;;  %v491_v18 = vpop.f32.mrf.mxu3 }
  0xcf   : > { %v492_v20 = vadd.f32 %v491_v18, %v444_v15  ;;  %v487_v22 = vadd.f32 %v486_v17, %v442_v16 }
  0xd1   : > { %v498_v23 = vpack.c.bf16 %v492_v20, %v490_v19  ;;  %v497_v30 = vpack.c.bf16 %v487_v22, %v485_v27 }
  0xd3   : > { %513 = vmatpush.bf16.msra.mxu1 %v498_v23 }
  0xd7   : > { %514 = vmatpush.bf16.msra.mxu1 %v497_v30 }
  0xdb   : > { %515 = vmatpush.bf16.msra.mxu1 %v496_v31 }
  0xde   : > { %816 = vmatmul.msk.bf16.vlgmr.msra.gmra.mxu1 %vm504_vm1, %v827_v32 }
 0x15b   : > { %v517_v38 = vpop.f32.mrf.mxu1 }
 0x15c   : > { %v532_v39 = vmul.f32 %v525_v37, %v517_v38  ;;  %v902_v37 = vld [vmem:[%s412_s28] ss:$0 sm:$0xff] }
 0x15e   : > { %v534_v40 = vmul.f32 %v532_v39, %v532_v39 }
 0x160   : > { %536 = vadd.xlane.f32.xlu1 %v534_v40 }
 0x163   : > { %v519_v42 = vpop.f32.mrf.mxu1 }
 0x164   : > { %v533_v43 = vmul.f32 %v530_v41, %v519_v42 }
 0x166   : > { %v535_v44 = vmul.f32 %v533_v43, %v533_v43 }
 0x168   : > { %538 = vadd.xlane.f32.xlu1 %v535_v44 }
 0x1d3   : > { %v537_v45 = vpop.xlane.xlu1 %536 }
 0x1d4   : > { %v540_v46 = vmax.f32 %v537_v45, 1e-24 }
 0x1d6   : > { %903 = vrsqrt.f32 %v540_v46  ;;  %vm548_vm5 = vweird.f32 %v540_v46 }
 0x1db   : > { %v539_v47 = vpop.xlane.xlu1 %538 }
 0x1dc   : > { %v904_v48 = vpop.eup %903  ;;  %v541_v49 = vmax.f32 %v539_v47, 1e-24 }
 0x1dd   : > { %v543_v50 = vmul.f32 %v904_v48, %v540_v46  ;;  %vm549_vm4 = vweird.f32 %v904_v48 }
 0x1de   : > { %905 = vrsqrt.f32 %v541_v49  ;;  %vm550_vm6 = vmor %vm548_vm5, %vm549_vm4  ;;  %vm558_vm8 = vweird.f32 %v541_v49 }
 0x1df   : > { %v544_v51 = vmul.f32 %v904_v48, %v543_v50 }
 0x1e1   : > { %v545_v52 = vmul.f32 0.5, %v544_v51 }
 0x1e3   : > { %v546_v53 = vsub.f32 1.5, %v545_v52 }
 0x1e4   : > { %v906_v54 = vpop.eup %905 }
 0x1e5   : > { %v553_v55 = vmul.f32 %v906_v54, %v541_v49  ;;  %v547_v57 = vmul.f32 %v904_v48, %v546_v53  ;;  %vm559_vm7 = vweird.f32 %v906_v54 }
 0x1e6   : > { %vm560_vm9 = vmor %vm558_vm8, %vm559_vm7 }
 0x1e7   : > { %v554_v56 = vmul.f32 %v906_v54, %v553_v55  ;;  %v551_v60 = vsel %vm550_vm6, %v904_v48, %v547_v57 }
 0x1e8   : > { %v562_v63 = vmul.f32 %v551_v60, %v532_v39 }
 0x1e9   : > { %v555_v58 = vmul.f32 0.5, %v554_v56 }
 0x1ea   : > { %v574_v5 = vmul.f32 %v899_v1, %v562_v63 }
 0x1eb   : > { %v556_v59 = vsub.f32 1.5, %v555_v58 }
 0x1ed   : > { %v557_v62 = vmul.f32 %v906_v54, %v556_v59 }
 0x1ef   : > { %v561_v2 = vsel %vm560_vm9, %v906_v54, %v557_v62 }
 0x1f0   : > { %v563_v3 = vmul.f32 %v561_v2, %v533_v43 }
 0x1f2   : > { %v575_v4 = vmul.f32 %v900_v0, %v563_v3 }
 0x1f4   : > { %v576_v6 = vadd.f32 %v575_v4, %v574_v5 }
 0x1f6   : > { %v577_v7 = vrot.slane %v576_v6, 4 }
 0x1f8   : > { %v578_v8 = vadd.f32 %v577_v7, %v576_v6 }
 0x1fa   : > { %v579_v9 = vrot.slane %v578_v8, 2 }
 0x1fc   : > { %v580_v10 = vadd.f32 %v579_v9, %v578_v8 }
 0x1fe   : > { %v581_v11 = vrot.slane %v580_v10, 1 }
 0x200   : > { %v582_v12 = vadd.f32 %v581_v11, %v580_v10 }
 0x202   : > { %v583_v13 = vmul.f32 0.0625, %v582_v12 }
 0x204   : > { %v584_v14 = vsub.f32 %v562_v63, %v583_v13  ;;  %v585_v15 = vsub.f32 %v563_v3, %v583_v13 }
 0x206   : > { %v586_v16 = vmul.f32 %v899_v1, %v584_v14  ;;  %v587_v17 = vmul.f32 %v900_v0, %v585_v15 }
 0x208   : > { %v588_v18 = vmul.f32 %v586_v16, %v586_v16  ;;  %v589_v19 = vmul.f32 %v587_v17, %v587_v17 }
 0x20a   : > { %v590_v20 = vadd.f32 %v589_v19, %v588_v18 }
 0x20c   : > { %v591_v21 = vrot.slane %v590_v20, 4 }
 0x20e   : > { %v592_v22 = vadd.f32 %v591_v21, %v590_v20 }
 0x210   : > { %v593_v23 = vrot.slane %v592_v22, 2 }
 0x212   : > { %v594_v24 = vadd.f32 %v593_v23, %v592_v22 }
 0x214   : > { %v595_v25 = vrot.slane %v594_v24, 1 }
 0x216   : > { %v596_v26 = vadd.f32 %v595_v25, %v594_v24 }
 0x218   : > { %v597_v27 = vmul.f32 0.0625, %v596_v26 }
 0x21a   : > { %v598_v28 = vadd.f32 1e-05, %v597_v27 }
 0x21c   : > { %907 = vrsqrt.f32 %v598_v28  ;;  %vm605_vm11 = vweird.f32 %v598_v28 }
 0x222   : > { %v908_v29 = vpop.eup %907 }
 0x223   : > { %v600_v30 = vmul.f32 %v908_v29, %v598_v28  ;;  %vm606_vm10 = vweird.f32 %v908_v29 }
 0x224   : > { %vm607_vm12 = vmor %vm605_vm11, %vm606_vm10 }
 0x225   : > { %v601_v31 = vmul.f32 %v908_v29, %v600_v30 }
 0x227   : > { %v602_v32 = vmul.f32 0.5, %v601_v31 }
 0x229   : > { %v603_v33 = vsub.f32 1.5, %v602_v32 }
 0x22b   : > { %v604_v34 = vmul.f32 %v908_v29, %v603_v33 }
 0x22d   : > { %v608_v36 = vsel %vm607_vm12, %v908_v29, %v604_v34 }
 0x22e   : > { %v609_v38 = vmul.f32 %v608_v36, %v584_v14  ;;  %v610_v39 = vmul.f32 %v608_v36, %v585_v15  ;;  %626 = sbr.rel (%p817_p1) target bundleno = 568 (0x238), region = 76 }
 0x230   : > { %v615_v40 = vmul.f32 %v901_v35, %v609_v38  ;;  %v616_v41 = vmul.f32 %v901_v35, %v610_v39 }
 0x232   : > { %v621_v42 = vadd.f32 %v902_v37, %v615_v40  ;;  %v622_v43 = vadd.f32 %v902_v37, %v616_v41 }
 0x234   : > { %v627_v44 = vmax.f32 %v621_v42, 0.0  ;;  %v628_v45 = vmax.f32 %v622_v43, 0.0 }
 0x236   : > { %629 = vst [vmem:[#allocation2] sm:$0xff] %v627_v44 }
 0x237   : > { %630 = vst [vmem:[#allocation2 + $0x8] sm:$0xff] %v628_v45 }
 0x238 PF: > { %p818_p4 = scmp.ne.s32.totalorder %s1122_s17, 1 }
 0x23a   : > { %634 = sbr.rel (%p818_p4) target bundleno = 833 (0x341), region = 80 }
 0x23f   : > { %653 = vmatpush.msra.mxu0 %v622_v43  ;;  %v635_v46 = vld [vmem:[%s1294_s7] sm:$0xff]  ;;  %v674_v47 = vld [vmem:[#allocation6 + $0x78] sm:$0xff]  ;;  %v672_v49 = vld [vmem:[#allocation6 + $0x68] sm:$0xff] }
 0x240   : > { %v673_v48 = vld [vmem:[#allocation6 + $0x70] sm:$0xff]  ;;  %679 = vmatpush.msra.mxu1 %v674_v47  ;;  %v671_v50 = vld [vmem:[#allocation6 + $0x60] sm:$0xff]  ;;  %v670_v51 = vld [vmem:[#allocation6 + $0x58] sm:$0xff] }
 0x241   : > { %654 = vmatpush.msra.mxu0 %v621_v42  ;;  %v669_v52 = vld [vmem:[#allocation6 + $0x50] sm:$0xff]  ;;  %v668_v53 = vld [vmem:[#allocation6 + $0x48] sm:$0xff]  ;;  %v667_v54 = vld [vmem:[#allocation6 + $0x40] sm:$0xff] }
 0x242   : > { %819 = vmatmul.msk.f32.vlgmr.msra.gmra.mxu0 %vm460_vm0, %v635_v46  ;;  %680 = vmatpush.msra.mxu1 %v673_v48  ;;  %v666_v55 = vld [vmem:[#allocation6 + $0x38] sm:$0xff]  ;;  %v665_v56 = vld [vmem:[#allocation6 + $0x30] sm:$0xff]  ;;  %v664_v57 = vld [vmem:[#allocation6 + $0x28] sm:$0xff] }
 0x243   : > { %v663_v58 = vld [vmem:[#allocation6 + $0x20] sm:$0xff]  ;;  %v662_v59 = vld [vmem:[#allocation6 + $0x18] sm:$0xff]  ;;  %v661_v60 = vld [vmem:[#allocation6 + $0x10] sm:$0xff] }
 0x244   : > { %681 = vmatpush.msra.mxu1 %v672_v49  ;;  %v660_v61 = vld [vmem:[#allocation6 + $0x8] sm:$0xff]  ;;  %v659_v62 = vld [vmem:[#allocation6] sm:$0xff]  ;;  %v909_v0 = vld [vmem:[%s1296_s9] ss:$0 sm:$0xff] }
 0x246   : > { %682 = vmatpush.msra.mxu1 %v671_v50 }
 0x248   : > { %683 = vmatpush.msra.mxu1 %v670_v51 }
 0x24a   : > { %684 = vmatpush.msra.mxu1 %v669_v52 }
 0x24c   : > { %685 = vmatpush.msra.mxu1 %v668_v53 }
 0x24e   : > { %686 = vmatpush.msra.mxu1 %v667_v54 }
 0x250   : > { %687 = vmatpush.msra.mxu1 %v666_v55 }
 0x252   : > { %688 = vmatpush.msra.mxu1 %v665_v56 }
 0x254   : > { %689 = vmatpush.msra.mxu1 %v664_v57 }
 0x256   : > { %690 = vmatpush.msra.mxu1 %v663_v58 }
 0x258   : > { %691 = vmatpush.msra.mxu1 %v662_v59 }
 0x25a   : > { %692 = vmatpush.msra.mxu1 %v661_v60 }
 0x25c   : > { %693 = vmatpush.msra.mxu1 %v660_v61 }
 0x25e   : > { %694 = vmatpush.msra.mxu1 %v659_v62 }
 0x2bf   : > { %v656_v63 = vpop.f32.mrf.mxu0 }
 0x2c0   : > { %695 = vmatmul.f32.vlgmr.msra.gmra.mxu1 %v656_v63 }
 0x33d   : > { %v696_v1 = vpop.f32.mrf.mxu1 }
 0x33e   : > { %v697_v2 = vadd.f32 %v909_v0, %v696_v1 }
 0x340   : > { %699 = vst [vmem:[#allocation8] sm:$0xff] %v697_v2 }
 0x341 PF: > { %s708_s22 = sshll.u32 %s1297_s10, 4  ;;  %s1047_s26 = smov [#allocation8]   ;;  %s709_s22 = int_to_ptr.hbm [resolvable:$true] %s708_s22 }
 0x342   : > { %s706_s19 = sshll.u32 %s1047_s26, 4  ;;  %s707_s19 = int_to_ptr.vmem [resolvable:$true] %s706_s19 }
 0x343   : > { %840 = dma.vmem_to_hbm [thread:$0]  (%p817_p1), %s707_s19, 128, %s709_s22, [#allocation5]  }
 0x344   : > { %1023 = dma.done.wait (%p817_p1), [#allocation5], 128  }
 0x345   : > { %1025 = vsyncadd (%p817_p1), [#allocation5], 4294967168 }
 0x346 PF: > { %s1308_s18 = sld [smem:[#allocation12_spill]]  ;;  %p22_p5 = scmp.ge.s32.totalorder %s1147_s25, 4  }
 0x347   : > { %s1309_s13 = smov %s1032_s14  ;;  %s1310_s14 = smov %s1036_s15 }
 0x348   : > { %s1312_s16 = smov %s1147_s25  ;;  %24 = sbr.rel (!%p22_p5) target bundleno = 7 (0x7), region = 119 }
 0x34c   : > { %s1311_s15 = smov %s1308_s18 }
 0x34d   :  { %722 = vsyncpa [#allocation4], 1 }
 0x34e   :  { %724 = vsyncpa [#allocation4 + $0x1], 1 }
 0x34f   :  { %725 = vsyncpa [#allocation7], 1 }
 0x350   :  { %726 = vsyncpa [#allocation5], 1 }
 0x351   :  { %728 = vsyncpa [#allocation5 + $0x1], 1 }

</bundles_post_ra>
